<compile_context>
chip_gen: v7x
topology: tpu7x:2x2x1
jax: 0.10.0
libtpu: 0.0.40
codegen_flags: <defaults>
</compile_context>

<pallas_src>
import math

import jax
import jax.numpy as jnp
from jax import lax
from jax.experimental import pallas as pl
from jax.experimental.pallas import tpu as pltpu


_SQRT2 = math.sqrt(2.0)
_VMEM_BUDGET = 10 * 1024 * 1024  # conservative vs the 16 MiB scoped-VMEM default on v5e


def _gelu_exact(x):
    # Matches torch.nn.GELU() default (approximate='none'): 0.5 * x * (1 + erf(x/sqrt(2)))
    return 0.5 * x * (1.0 + lax.erf(x / _SQRT2))


# --------------------------------------------------------------------------------------
# Kernels
# --------------------------------------------------------------------------------------

def _pec_kernel_fused(x_ref, w1_ref, w2_ref, o_ref):
    # x_ref : (S, TILE_BC)   lane-dense activation tile for the current phase
    # w1_ref: (H, S)         per-phase conv1 weight (Conv1d k=1 squeezed: (out, in))
    # w2_ref: (S, H)         per-phase conv2 weight
    # o_ref : (S, TILE_BC)
    h = jnp.dot(w1_ref[...], x_ref[...], preferred_element_type=jnp.float32)  # (H, TILE_BC)
    h = _gelu_exact(h)                   # GELU in f32 on all generations
    h = h.astype(w2_ref.dtype)           # back to compute dtype for the 2nd MXU pass
    o = jnp.dot(w2_ref[...], h, preferred_element_type=jnp.float32)           # (S, TILE_BC)
    o_ref[...] = o.astype(o_ref.dtype)


def _pec_kernel_natural(x_ref, w1_ref, w2_ref, o_ref):
    # x_ref : (TILE_B, S, TILE_C)  phase-p activation tile in the natural layout
    # w1_ref: (H, S),  w2_ref: (S, H)
    # o_ref : (TILE_B, S, TILE_C)
    w1 = w1_ref[...]
    w2 = w2_ref[...]
    # Small static unroll over the batch tile: keeps both matmuls as plain 2-D MXU
    # passes with the 128-lane TILE_C on the minor axis and avoids any in-kernel
    # (XLU) transposes a batched einsum would introduce.
    for b in range(x_ref.shape[0]):
        h = jnp.dot(w1, x_ref[b], preferred_element_type=jnp.float32)   # (H, TILE_C)
        h = _gelu_exact(h).astype(w2.dtype)
        o = jnp.dot(w2, h, preferred_element_type=jnp.float32)          # (S, TILE_C)
        o_ref[b] = o.astype(o_ref.dtype)


# --------------------------------------------------------------------------------------
# Tile selection
# --------------------------------------------------------------------------------------

def _pad8(n):
    return max(8, -(-n // 8) * 8)


def _choose_tile_bc(bc, s, h, itemsize, budget_bytes=_VMEM_BUDGET):
    """Lane tile of the fused B*C dim for the transpose path.

    Multiple of 128 dividing B*C, or the full extent when B*C is not 128-aligned
    (a block equal to the full dim always satisfies the (8,128) rule).  Sized so the
    double-buffered in/out tiles plus the f32 hidden intermediate fit the budget.
    """
    if bc % 128 != 0:
        return bc
    s_pad, h_pad = _pad8(s), _pad8(h)
    best = 128
    tile = 128
    while tile <= min(bc, 16384):
        if bc % tile == 0:
            per_tile = tile * (4 * s_pad * itemsize + 4 * h_pad)
            if per_tile <= budget_bytes:
                best = tile
        tile += 128
    return best


def _choose_tiles_natural(b, s, h, c, itemsize, budget_bytes=_VMEM_BUDGET, max_tile_b=8):
    """(tile_b, tile_c) for the natural-layout path; tile_c is a 128-multiple dividing C."""
    s_pad, h_pad = _pad8(s), _pad8(h)

    def mem(tb, tc):
        # 2x double-buffered input + output tiles in compute dtype + f32 hidden tile.
        return tb * tc * (4 * s_pad * itemsize + 4 * h_pad)

    tile_c = 128
    t = 128
    while t <= min(c, 16384):
        if c % t == 0 and mem(1, t) <= budget_bytes:
            tile_c = t
        t += 128
    tile_b = 1
    for tb in range(1, min(b, max_tile_b) + 1):
        if b % tb == 0 and mem(tb, tile_c) <= budget_bytes:
            tile_b = tb
    return tile_b, tile_c


# --------------------------------------------------------------------------------------
# pallas_call wrappers for the two paths
# --------------------------------------------------------------------------------------

def _run_fused(xg, w1, w2, *, out_dtype):
    """xg: (P, S, BC) phase-major activations, lane-fused batch*feature."""
    P, S, BC = xg.shape
    H = w1.shape[1]
    tile_bc = _choose_tile_bc(BC, S, H, jnp.dtype(xg.dtype).itemsize)
    n_bc = BC // tile_bc

    grid_spec = pltpu.PrefetchScalarGridSpec(
        num_scalar_prefetch=0,
        grid=(P, n_bc),  # p outer: weight block index constant over the inner axis,
                         # so per-phase weights are not re-DMA'd per BC tile.
        in_specs=[
            pl.BlockSpec((None, S, tile_bc), lambda p, r: (p, 0, r)),
            pl.BlockSpec((None, H, S), lambda p, r: (p, 0, 0)),
            pl.BlockSpec((None, S, H), lambda p, r: (p, 0, 0)),
        ],
        out_specs=pl.BlockSpec((None, S, tile_bc), lambda p, r: (p, 0, r)),
    )
    return pl.pallas_call(
        _pec_kernel_fused,
        out_shape=jax.ShapeDtypeStruct((P, S, BC), out_dtype),
        grid_spec=grid_spec,
        compiler_params=pltpu.CompilerParams(
            # No reduction axis: both grid axes are independent (2-TC sharding on v7x).
            dimension_semantics=("parallel", "parallel"),
        ),
    )(xg, w1, w2)


def _run_natural(x3, w1, w2, *, B, S, C, out_dtype):
    """x3: (B, S, P*C) -- free reshape of (B, T, C); phase p owns lanes [p*C, (p+1)*C)."""
    P, H, _ = w1.shape
    itemsize = jnp.dtype(x3.dtype).itemsize
    tile_b, tile_c = _choose_tiles_natural(B, S, H, C, itemsize)
    n_b, n_c = B // tile_b, C // tile_c

    grid_spec = pltpu.PrefetchScalarGridSpec(
        num_scalar_prefetch=0,
        grid=(P, n_b, n_c),  # p outer: weights stay VMEM-resident across all tiles.
        in_specs=[
            pl.BlockSpec((tile_b, S, tile_c),
                         lambda p, bi, ci: (bi, 0, p * n_c + ci)),
            pl.BlockSpec((None, H, S), lambda p, bi, ci: (p, 0, 0)),
            pl.BlockSpec((None, S, H), lambda p, bi, ci: (p, 0, 0)),
        ],
        out_specs=pl.BlockSpec((tile_b, S, tile_c),
                               lambda p, bi, ci: (bi, 0, p * n_c + ci)),
    )
    return pl.pallas_call(
        _pec_kernel_natural,
        out_shape=jax.ShapeDtypeStruct((B, S, P * C), out_dtype),
        grid_spec=grid_spec,
        compiler_params=pltpu.CompilerParams(
            dimension_semantics=("parallel", "parallel", "parallel"),
        ),
    )(x3, w1, w2)


# --------------------------------------------------------------------------------------
# Public entry point
# --------------------------------------------------------------------------------------

def sampling_block_pallas(x, w1, w2, P, *, compute_dtype=None):
    """
    x : (B, T, C) activations in the PyTorch SamplingBlock layout
    w1: (P, H, S) per-phase conv1 weights, S = T // P
    w2: (P, S, H) per-phase conv2 weights
    compute_dtype: optional MXU input dtype (e.g. jnp.bfloat16 on v6e/v7x).  The
        matmuls always accumulate in f32 and the result is returned in x.dtype.
    """
    B, T, C = x.shape
    assert T % P == 0, "tokens_dim must be divisible by highest_freq_period"
    S = T // P
    H = w1.shape[1]
    assert w1.shape == (P, H, S) and w2.shape == (P, S, H)
    compute_dtype = x.dtype if compute_dtype is None else compute_dtype
    out_dtype = x.dtype

    w1c = w1.astype(compute_dtype)
    w2c = w2.astype(compute_dtype)

    if C % 128 == 0:
        # Fast path: phase slices are contiguous lane-aligned chunks of the freely
        # reshaped (B, S, P*C) array, so the kernel reads/writes x exactly once.
        x3 = x.reshape(B, S, P * C).astype(compute_dtype)
        out = _run_natural(x3, w1c, w2c, B=B, S=S, C=C, out_dtype=out_dtype)
        return out.reshape(B, T, C)

    # Fallback: the strided phase gather/scatter cannot be expressed by a BlockSpec
    # index_map when C is not lane-aligned, so regroup on the host to a lane-dense
    # (P, S, B*C) slab and scatter back afterwards.
    # TODO(synk): if the surrounding model can keep activations in (P, S, B*C) layout
    # end-to-end, call _run_fused directly and drop both host transposes.
    xg = x.reshape(B, S, P, C)
    xg = jnp.transpose(xg, (2, 1, 0, 3)).reshape(P, S, B * C).astype(compute_dtype)
    out = _run_fused(xg, w1c, w2c, out_dtype=out_dtype)
    y = out.reshape(P, S, B, C)
    y = jnp.transpose(y, (2, 1, 0, 3)).reshape(B, T, C)
    return y


def sampling_block_reference(x, w1, w2, P):
    """Pure-JAX transliteration of the PyTorch forward (for correctness checking)."""
    B, T, C = x.shape
    xt = jnp.transpose(x, (0, 2, 1))                 # (B, C, T)  == x.transpose(1, 2)
    y = jnp.zeros_like(xt)
    for idx in range(P):
        xp = xt[:, :, idx::P]                        # (B, C, S)
        xp = jnp.transpose(xp, (0, 2, 1))            # (B, S, C)  == permute(0, 2, 1)
        h = jnp.einsum('hs,bsc->bhc', w1[idx], xp)   # conv1 (k=1, no bias)
        h = _gelu_exact(h)
        o = jnp.einsum('sh,bhc->bsc', w2[idx], h)    # conv2 (k=1, no bias)
        o = jnp.transpose(o, (0, 2, 1))              # (B, C, S)
        y = y.at[:, :, idx::P].set(o)                # FSABlock interleave
    return jnp.transpose(y, (0, 2, 1))               # transpose back


if __name__ == "__main__":
    key = jax.random.PRNGKey(0)

    # ---- Case 1: small, lane-unaligned C -> transpose fallback path ------------------
    B, tokens_dim, C, P, H = 2, 16, 4, 4, 8
    S = tokens_dim // P
    kx, k1, k2, kx2 = jax.random.split(key, 4)
    x = jax.random.normal(kx, (B, tokens_dim, C), dtype=jnp.float32)
    w1 = 0.1 * jax.random.normal(k1, (P, H, S), dtype=jnp.float32)  # conv1: (out=H, in=S)
    w2 = 0.1 * jax.random.normal(k2, (P, S, H), dtype=jnp.float32)  # conv2: (out=S, in=H)

    y_ref = jax.block_until_ready(sampling_block_reference(x, w1, w2, P))
    y_f32 = jax.block_until_ready(sampling_block_pallas(x, w1, w2, P))
    assert y_f32.shape == x.shape
    assert jnp.allclose(y_f32, y_ref, atol=1e-5, rtol=1e-5), "f32 fallback-path mismatch"

    # Optional bf16 MXU path (halves HBM/VMEM traffic on v6e/v7x); looser tolerance.
    y_bf16 = jax.block_until_ready(
        sampling_block_pallas(x, w1, w2, P, compute_dtype=jnp.bfloat16))
    assert jnp.allclose(y_bf16, y_ref, atol=5e-2, rtol=5e-2), "bf16 fallback-path mismatch"

    # ---- Case 2: lane-aligned C -> natural-layout single-pass path -------------------
    C2 = 128
    x2 = jax.random.normal(kx2, (B, tokens_dim, C2), dtype=jnp.float32)
    y2_ref = jax.block_until_ready(sampling_block_reference(x2, w1, w2, P))
    y2 = jax.block_until_ready(sampling_block_pallas(x2, w1, w2, P))
    assert y2.shape == x2.shape
    assert jnp.allclose(y2, y2_ref, atol=1e-5, rtol=1e-5), "f32 natural-path mismatch"

    print("KERNEL_OK")
</pallas_src>

<mosaic_0001>
module attributes {stable_mosaic.version = 11 : i64} {
  func.func @_pec_kernel_fused(%arg0: i32, %arg1: i32, %arg2: memref<1x4x8xf32, #tpu.memory_space<vmem>>, %arg3: memref<1x8x4xf32, #tpu.memory_space<vmem>>, %arg4: memref<1x4x8xf32, #tpu.memory_space<vmem>>, %arg5: memref<1x4x8xf32, #tpu.memory_space<vmem>>) attributes {dimension_semantics = [#tpu.dimension_semantics<parallel>, #tpu.dimension_semantics<parallel>], iteration_bounds = array<i64: 4, 1>, scalar_prefetch = 0 : i64, scratch_operands = 0 : i64, tpu.core_type = #tpu.core_type<tc>, window_params = [{transform_indices = @transform_0, window_bounds = array<i64: 1, 4, 8>}, {transform_indices = @transform_1, window_bounds = array<i64: 1, 8, 4>}, {transform_indices = @transform_2, window_bounds = array<i64: 1, 4, 8>}, {transform_indices = @transform_3, window_bounds = array<i64: 1, 4, 8>}]} {
    %c0 = arith.constant 0 : index
    %c0_0 = arith.constant 0 : index
    %c0_1 = arith.constant 0 : index
    %0 = vector.load %arg3[%c0, %c0_0, %c0_1] : memref<1x8x4xf32, #tpu.memory_space<vmem>>, vector<1x8x4xf32>
    %1 = vector.shape_cast %0 : vector<1x8x4xf32> to vector<8x4xf32>
    %c0_2 = arith.constant 0 : index
    %c0_3 = arith.constant 0 : index
    %c0_4 = arith.constant 0 : index
    %2 = vector.load %arg2[%c0_2, %c0_3, %c0_4] : memref<1x4x8xf32, #tpu.memory_space<vmem>>, vector<1x4x8xf32>
    %3 = vector.shape_cast %2 : vector<1x4x8xf32> to vector<4x8xf32>
    %cst = arith.constant dense<0.000000e+00> : vector<8x8xf32>
    %4 = tpu.matmul %1, %3, %cst {dimension_numbers = #tpu.dot_dimension_numbers<[1], [0], [0], [1], [0, 0, 1, 1], [], []>} : vector<8x4xf32>, vector<4x8xf32>, vector<8x8xf32> -> vector<8x8xf32>
    %cst_5 = arith.constant 5.000000e-01 : f32
    %5 = vector.broadcast %cst_5 : f32 to vector<8x8xf32>
    %6 = arith.mulf %5, %4 : vector<8x8xf32>
    %cst_6 = arith.constant 1.41421354 : f32
    %7 = vector.broadcast %cst_6 : f32 to vector<8x8xf32>
    %8 = arith.divf %4, %7 : vector<8x8xf32>
    %9 = math.erf %8 : vector<8x8xf32>
    %cst_7 = arith.constant 1.000000e+00 : f32
    %10 = vector.broadcast %cst_7 : f32 to vector<8x8xf32>
    %11 = arith.addf %10, %9 : vector<8x8xf32>
    %12 = arith.mulf %6, %11 : vector<8x8xf32>
    %c0_8 = arith.constant 0 : index
    %c0_9 = arith.constant 0 : index
    %c0_10 = arith.constant 0 : index
    %13 = vector.load %arg4[%c0_8, %c0_9, %c0_10] : memref<1x4x8xf32, #tpu.memory_space<vmem>>, vector<1x4x8xf32>
    %14 = vector.shape_cast %13 : vector<1x4x8xf32> to vector<4x8xf32>
    %cst_11 = arith.constant dense<0.000000e+00> : vector<4x8xf32>
    %15 = tpu.matmul %14, %12, %cst_11 {dimension_numbers = #tpu.dot_dimension_numbers<[1], [0], [0], [1], [0, 0, 1, 1], [], []>} : vector<4x8xf32>, vector<8x8xf32>, vector<4x8xf32> -> vector<4x8xf32>
    %c0_12 = arith.constant 0 : index
    %c0_13 = arith.constant 0 : index
    %c0_14 = arith.constant 0 : index
    %16 = vector.load %arg5[%c0_12, %c0_13, %c0_14] : memref<1x4x8xf32, #tpu.memory_space<vmem>>, vector<1x4x8xf32>
    %17 = vector.shape_cast %16 : vector<1x4x8xf32> to vector<4x8xf32>
    %18 = vector.shape_cast %15 : vector<4x8xf32> to vector<1x4x8xf32>
    tpu.vector_store %arg5[%c0_12, %c0_13, %c0_14], %18 {strides = array<i32>} : memref<1x4x8xf32, #tpu.memory_space<vmem>>, vector<1x4x8xf32>,
    return
  }
  func.func @transform_0(%arg0: i32, %arg1: i32) -> (i32, i32, i32) {
    %c0_i32 = arith.constant 0 : i32
    %c0_i32_0 = arith.constant 0 : i32
    return %arg0, %c0_i32, %arg1 : i32, i32, i32
  }
  func.func @transform_1(%arg0: i32, %arg1: i32) -> (i32, i32, i32) {
    %c0_i32 = arith.constant 0 : i32
    %c0_i32_0 = arith.constant 0 : i32
    %c0_i32_1 = arith.constant 0 : i32
    return %arg0, %c0_i32, %c0_i32_0 : i32, i32, i32
  }
  func.func @transform_2(%arg0: i32, %arg1: i32) -> (i32, i32, i32) {
    %c0_i32 = arith.constant 0 : i32
    %c0_i32_0 = arith.constant 0 : i32
    %c0_i32_1 = arith.constant 0 : i32
    return %arg0, %c0_i32, %c0_i32_0 : i32, i32, i32
  }
  func.func @transform_3(%arg0: i32, %arg1: i32) -> (i32, i32, i32) {
    %c0_i32 = arith.constant 0 : i32
    %c0_i32_0 = arith.constant 0 : i32
    return %arg0, %c0_i32, %arg1 : i32, i32, i32
  }
}

</mosaic_0001>

<bundles_post_ra>
// kernel: tpu_custom_call.1
= control target key start
LH: loop header
LB: loop body
LE: loop exit
PB: predicated region body
PF: predicated region fallthrough
CT: control target
= control target key end

     0   :  { %8 = vsyncpa [#allocation3], 0  ;;  %s808_s0 = inlined_call_operand.vmem [shape: f32[4,4,8], index: 0, kind: input, shape index: {}]   ;;  %s809_s1 = inlined_call_operand.vmem [shape: f32[4,8,4], index: 1, kind: input, shape index: {}]   ;;  %s810_s2 = inlined_call_operand.vmem [shape: f32[4,4,8], index: 2, kind: input, shape index: {}]   ;;  %s811_s3 = inlined_call_operand.hbm [shape: f32[4,4,8], index: 3, kind: output, shape index: {}]  }
   0x1   :  { %10 = vsyncpa [#allocation3 + $0x1], 0  ;;  %s690_s12 = smov 0   ;;  %s692_s13 = smov 0  }
   0x2   :  { %s694_s14 = smov 0   ;;  %s696_s15 = smov 0  }
   0x3   :  { %s698_s16 = smov 0   ;;  %s700_s17 = smov 0  }
   0x4 LB: > { %s498_s18 = sadd.s32 4294967295, %s665_s17   ;;  %s499_s19 = sadd.s32 4294967294, %s665_s17   ;;  %s665_s17 = sphi %s700_s17, %s16_s17   ;;  %s661_s16 = sphi %s698_s16, %s818_s16   ;;  %s657_s15 = sphi %s696_s15, %s817_s15   ;;  %s653_s14 = sphi %s694_s14, %s816_s14   ;;  %s649_s13 = sphi %s692_s13, %s815_s13   ;;  %s645_s12 = sphi %s690_s12, %s814_s12  }
   0x5   : > { %s28_s20 = sadd.s32 1, %s661_s16  ;;  %s117_s21 = sadd.s32 1, %s653_s14 }
   0x6   : > { %p30_p0 = scmp.ge.s32.totalorder %s28_s20, 4  ;;  %p127_p1 = scmp.ne.s32.totalorder %s653_s14, %s649_s13 }
   0x7   : > { %p128_p2 = scmp.eq.s32.totalorder %s498_s18, 3  ;;  %p133_p3 = scmp.ne.s32.totalorder %s649_s13, %s645_s12 }
   0x8   : > { %s820_s20 = smov (%p30_p0, %s28_s20), 0  ;;  %p134_p5 = scmp.eq.s32.totalorder %s499_s19, 3 }
   0x9   : > { %p730_p4 = por %p128_p2, %p127_p1  ;;  %s112_s23 = ssub.s32 %s661_s16, %s820_s20 }
   0xa   : > { %p502_p6 = scmp.ge.s32.totalorder %s665_s17, 1  ;;  %p115_p7 = scmp.eq.s32.totalorder %s112_s23, 0 }
   0xb   : > { %p737_p8 = por %p134_p5, %p133_p3  ;;  %p176_p9 = scmp.lt.s32.totalorder %s665_s17, 5 }
   0xc   : > { %s743_s25 = scalar_select %p115_p7, %s653_s14, %s117_s21  }
   0xd   : > { %p177_p10 = pnand %p502_p6, %p176_p9 }
   0xe   : > { %p210_p11 = scmp.lt.s32.totalorder (!%p177_p10), %s657_s15, 3  ;;  %v667_v0 = vmov (!%p177_p10), 0.0   ;;  %vm668_vm0 = vmmov (!%p177_p10), 0   ;;  %vm231_vm1 = vcmask (!%p177_p10), 1043456   ;;  %vm227_vm2 = vcmask (!%p177_p10), 31744   ;;  %s207_s11 = sand.u32 (!%p177_p10), 1, %s649_s13  }
   0xf   : > { %180 = sbr.rel (%p177_p10) target bundleno = 484 (0x1e4), region = 32  ;;  %518 = vmatprep.subr.mxu0 (!%p177_p10), %v667_v0  ;;  %520 = vmatprep.mubr.msk.f32.mxu0 (!%p177_p10), %vm668_vm0, %v667_v0  ;;  %vm312_vm3 = vcmask (!%p177_p10), 64512   ;;  %s503_s18 = sshll.u32 (!%p177_p10), %s207_s11, 2  ;;  %vm386_vm4 = vcmask (!%p177_p10), 60416  }
  0x10   : > { %523 = vmatprep.subr.mxu1 (!%p177_p10), %v667_v0  ;;  %525 = vmatprep.mubr.msk.f32.mxu1 (!%p177_p10), %vm668_vm0, %v667_v0  ;;  %s511_s19 = sshll.u32 (!%p177_p10), %s657_s15, 6  ;;  %s209_s21 = scalar_lea.vmem (!%p177_p10), [#allocation2], %s503_s18 }
  0x11   : > { %s403_s23 = sshll.u32 (!%p177_p10), %s209_s21, 4  ;;  %s761_s29 = scalar_lea.hbm (!%p177_p10), %s811_s3, %s511_s19  ;;  %s763_s23 = int_to_ptr.vmem [resolvable:$true] %s403_s23 }
  0x12   : > { %s587_s30 = scalar_lea.vmem (!%p177_p10), %s763_s23, 64 }
  0x13   : > { %p588_p12 = scmp.ne.s32.totalorder (!%p177_p10), %s763_s23, %s587_s30 }
  0x15   : > { %p589_p13 = pnand (!%p177_p10), %p588_p12, %p730_p4 }
  0x16   : > { %s211_s26 = scalar_select %p210_p11, %s657_s15, 3 }
  0x17   : > { %p590_p0 = pneg %p589_p13  ;;  %s669_s15 = smov [#allocation2]  }
  0x18   : > { %s504_s27 = sshll.u32 %s211_s26, 2  ;;  %s505_s28 = sshll.u32 %s211_s26, 3 }
  0x19   : > { %s216_s4 = scalar_lea.vmem %s808_s0, %s504_s27  ;;  %s220_s7 = scalar_lea.vmem %s809_s1, %s505_s28 }
  0x1a   : > { %v226_v1 = vld [vmem:[%s216_s4] sm:$0xf]  ;;  %s224_s10 = scalar_lea.vmem %s810_s2, %s504_s27  ;;  %s389_s27 = scalar_lea.sflag [#allocation3], %s207_s11 }
  0x1b   : > { %v225_v2 = vld [vmem:[%s220_s7] sm:$0xff]  ;;  %519 = vmatpush3.msk.msra.mxu0 %vm231_vm1, %v226_v1  ;;  %s591_s4 = sshll.u32 %s669_s15, 4  ;;  %s592_s4 = int_to_ptr.vmem [resolvable:$false] %s591_s4 }
  0x1c   : > { %521 = vmatmul.mubr.msk.f32.vlgmr.msra.gmra.mrb[0].mxu0 %vm227_vm2, %v225_v2  ;;  %v311_v10 = vld [vmem:[%s224_s10] sm:$0xf]  ;;  %s593_s5 = scalar_lea.vmem %s592_s4, 128  ;;  %p594_p1 = scmp.lt.s32.totalorder %s763_s23, %s592_s4 }
  0x1d   : > { %p595_p2 = scmp.lt.s32.totalorder %s593_s5, %s587_s30 }
  0x1f   : > { %p596_p3 = por %p595_p2, %p594_p1 }
  0x21   : > { %p597_p5 = pnand %p596_p3, %p590_p0 }
  0xef   : > { %v301_v3 = vpop.f32.mrb[0].mxu0 }
  0xf0   : > { %v307_v4 = vmul.f32 0.70710677, %v301_v3  ;;  %v522_v5 = vpop.f32.mrb[1].mxu0  ;;  %v305_v7 = vmul.f32 0.5, %v301_v3 }
  0xf2   : > { %585 = verf.f32 %v307_v4 }
  0xfc   : > { %v586_v6 = vpop.eup %585 }
  0xfd   : > { %v309_v8 = vadd.f32 1.0, %v586_v6 }
  0xff   : > { %v310_v9 = vmul.f32 %v309_v8, %v305_v7 }
 0x101   : > { %524 = vmatpush3.msra.mxu1 %v310_v9 }
 0x102   : > { %526 = vmatmul.mubr.msk.f32.vlgmr.msra.gmra.mrb[0].mxu1 %vm312_vm3, %v311_v10 }
 0x1d5   : > { %v382_v11 = vpop.f32.mrb[0].mxu1 }
 0x1d6   : > { %387 = vst.msk [vmem:[%s209_s21] sm:$0xf] %vm386_vm4, %v382_v11  ;;  %v527_v12 = vpop.f32.mrb[1].mxu1 }
 0x1d7   : > { %600 = shalt.err (!%p597_p5)
}
 0x1d8   : > { %s601_s6 = scalar_lea.hbm %s761_s29, 64  ;;  %s605_s9 = scalar_lea.hbm %s811_s3, 256 }
 0x1d9   : > { %p602_p6 = scmp.ne.s32.totalorder %s761_s29, %s601_s6  ;;  %p606_p10 = scmp.lt.u32.totalorder %s761_s29, %s811_s3 }
 0x1da   : > { %p607_p11 = scmp.lt.u32.totalorder %s605_s9, %s601_s6  ;;  %p609_p13 = scmp.lt.u32.totalorder %s601_s6, %s761_s29 }
 0x1db   : > { %p603_p7 = pnand %p602_p6, %p730_p4 }
 0x1dc   : > { %p608_p12 = por %p607_p11, %p606_p10 }
 0x1dd   : > { %p604_p9 = pneg %p603_p7 }
 0x1de   : > { %p610_p0 = por %p609_p13, %p608_p12 }
 0x1e0   : > { %p611_p1 = pnand %p610_p0, %p604_p9 }
 0x1e2   : > { %614 = shalt.err (!%p611_p1)
}
 0x1e3   : > { %528 = dma.vmem_to_hbm [thread:$0]  (%p730_p4), %s763_s23, 64, %s761_s29, %s389_s27  }
 0x1e4 PF: > { %p534_p2 = scmp.ge.s32.totalorder %s665_s17, 2  ;;  %s415_s18 = sand.u32 1, %s645_s12  }
 0x1e5   : > { %s416_s19 = scalar_lea.sflag [#allocation3], %s415_s18 }
 0x1e6   : > { %p531_p3 = pnand %p534_p2, %p737_p8 }
 0x1e8   : > { %640 = dma.done.wait (!%p531_p3), %s416_s19, 64  }
 0x1e9   : > { %642 = vsyncadd (!%p531_p3), %s416_s19, 4294967232  ;;  %s16_s17 = sadd.s32 1, %s665_s17   ;;  %s814_s12 = smov %s649_s13 }
 0x1ea   : > { %p13_p5 = scmp.ge.s32.totalorder %s16_s17, 6   ;;  %s815_s13 = smov %s653_s14 }
 0x1eb   : > { %s816_s14 = smov %s743_s25  ;;  %s817_s15 = smov %s661_s16 }
 0x1ec   : > { %s818_s16 = smov %s820_s20  ;;  %15 = sbr.rel (!%p13_p5) target bundleno = 4 (0x4), region = 73 }
 0x1f3   :  { %421 = vsyncpa [#allocation3], 1 }
 0x1f4   :  { %423 = vsyncpa [#allocation3 + $0x1], 1 }

</bundles_post_ra>
